<compile_context>
chip_gen: v5e
topology: v5e:2x2
jax: 0.10.0
libtpu: 0.0.40
codegen_flags: <defaults>
</compile_context>

<pallas_src>
import jax
import jax.numpy as jnp
from jax.experimental import pallas as pl
from jax.experimental.pallas import tpu as pltpu

LANE = 128


def _round_up(n, m):
    return (n + m - 1) // m * m


def _simclr_kernel(x_ref, cw_ref, cb_ref, pool_ref, w1_ref, w2_ref,
                   h_ref, z_ref, h_acc):
    # x_ref   : (tm, K)      bf16 im2col patch tile (tm = n_img * HW rows)
    # cw_ref  : (K, Fp)      bf16 conv weight (9C, F), F zero-padded to 128
    # cb_ref  : (1, Fp)      f32  conv bias
    # pool_ref: (n_img, tm)  f32  tile-local block-diag average pool (1/HW)
    # w1_ref  : (Fp, Fp)     bf16 projector layer 1, (in, out)
    # w2_ref  : (Fp, Pp)     bf16 projector layer 2, (in, out)
    # h_ref   : (B, Fp)      f32  per-view encoder features (stored on last m)
    # z_ref   : (B, Pp)      f32  per-view projections      (stored on last m)
    # h_acc   : (B, Fp)      f32  VMEM staging for pooled features
    m = pl.program_id(1)
    n_img = pool_ref.shape[0]

    # Conv3x3(pad=1) + bias + ReLU: one bf16 MXU matmul with f32 accumulation,
    # f32 VPU epilogue on the small (tm, Fp) tile.
    conv = jnp.dot(x_ref[...], cw_ref[...], preferred_element_type=jnp.float32)
    conv = jnp.maximum(conv + cb_ref[...], 0.0)

    # Tile-local global-average pool on the MXU: (n_img, tm) @ (tm, Fp).
    h_tile = jnp.dot(pool_ref[...], conv, preferred_element_type=jnp.float32)
    h_acc[pl.ds(m * n_img, n_img), :] = h_tile

    # Projector + output stores once per view, on the last M tile.
    @pl.when(m == pl.num_programs(1) - 1)
    def _():
        h = h_acc[...]
        h_ref[...] = h
        p = jnp.maximum(
            jnp.dot(h.astype(w1_ref.dtype), w1_ref[...],
                    preferred_element_type=jnp.float32), 0.0)
        z_ref[...] = jnp.dot(p.astype(w2_ref.dtype), w2_ref[...],
                             preferred_element_type=jnp.float32)


def simclr_forward(x_i, x_j, conv_w, conv_b, w1, w2, projection_dim,
                   tile_rows=None):
    """x_i, x_j: (B, C, H, W) float32 (PyTorch NCHW convention)."""
    B, C, H, W = x_i.shape
    F = conv_w.shape[0]
    P = projection_dim
    HW = H * W
    K = 9 * C
    Fp = _round_up(F, LANE)
    Pp = _round_up(P, LANE)

    # M tile: a multiple of HW so every tile holds whole images (pooling stays
    # tile-local, no cross-tile accumulation).  For real encoder sizes, size
    # tm against VMEM: 2 (double-buffer) * tm * K * 2B (bf16) + weights +
    # (B, Fp) scratch must fit 64 MiB physical / 32 MiB scoped on v7x
    # (128 MiB on v5e/v6e); here everything is tiny.
    tm = HW if tile_rows is None else tile_rows
    assert tm % HW == 0 and (B * HW) % tm == 0
    n_m = (B * HW) // tm
    n_img = tm // HW

    # ---- wrapper-side layout: bf16 cast, im2col, no lane pad on K ----
    x = jnp.concatenate([x_i, x_j], axis=0).astype(jnp.bfloat16)  # (2B,C,H,W)
    xn = jnp.transpose(x, (0, 2, 3, 1))                           # NCHW->NHWC
    xp = jnp.pad(xn, ((0, 0), (1, 1), (1, 1), (0, 0)))
    cols = [xp[:, kh:kh + H, kw:kw + W, :]
            for kh in range(3) for kw in range(3)]
    col = jnp.concatenate(cols, axis=-1).reshape(2, B * HW, K)    # (view,M,K)

    # Conv weight (F, C, 3, 3) -> (3, 3, C, F) -> (9C, F), tap-major (matches
    # the im2col column order), lane-pad F only, cast to bf16.
    cw = jnp.transpose(conv_w, (2, 3, 1, 0)).reshape(K, F)
    cw = jnp.pad(cw, ((0, 0), (0, Fp - F))).astype(jnp.bfloat16)
    cb = jnp.pad(conv_b, (0, Fp - F)).reshape(1, Fp)              # f32

    # Projector weights, transposed to (in, out), zero-padded, bf16.
    w1_t = jnp.pad(jnp.transpose(w1), ((0, Fp - F), (0, Fp - F))).astype(jnp.bfloat16)
    w2_t = jnp.pad(jnp.transpose(w2), ((0, Fp - F), (0, Pp - P))).astype(jnp.bfloat16)

    # Tile-local block-diagonal average-pool matrix (1/HW baked in): maps the
    # tm rows of one tile to its n_img images.  Batch-size independent.
    row_img = jnp.repeat(jnp.arange(n_img), HW)                   # (tm,)
    pool = (jnp.arange(n_img)[:, None] == row_img[None, :]).astype(jnp.float32)
    pool = pool * (1.0 / HW)                                      # (n_img, tm)

    flops = (2 * (2 * B * HW) * K * Fp          # conv matmul
             + 2 * (2 * B) * HW * Fp            # pooling matmul
             + 2 * (2 * B) * Fp * Fp            # projector layer 1
             + 2 * (2 * B) * Fp * Pp)           # projector layer 2
    bytes_accessed = (2 * (col.size + cw.size + w1_t.size + w2_t.size)
                      + 4 * (cb.size + pool.size
                             + 2 * B * Fp + 2 * B * Pp))

    h_out, z_out = pl.pallas_call(
        _simclr_kernel,
        grid=(2, n_m),                           # (view, M tile)
        in_specs=[
            pl.BlockSpec((None, tm, K), lambda v, m: (v, m, 0)),
            pl.BlockSpec((K, Fp), lambda v, m: (0, 0)),
            pl.BlockSpec((1, Fp), lambda v, m: (0, 0)),
            pl.BlockSpec((n_img, tm), lambda v, m: (0, 0)),
            pl.BlockSpec((Fp, Fp), lambda v, m: (0, 0)),
            pl.BlockSpec((Fp, Pp), lambda v, m: (0, 0)),
        ],
        out_specs=(
            pl.BlockSpec((None, B, Fp), lambda v, m: (v, 0, 0)),
            pl.BlockSpec((None, B, Pp), lambda v, m: (v, 0, 0)),
        ),
        out_shape=(
            jax.ShapeDtypeStruct((2, B, Fp), jnp.float32),   # h (lane-padded)
            jax.ShapeDtypeStruct((2, B, Pp), jnp.float32),   # z (lane-padded)
        ),
        scratch_shapes=[pltpu.VMEM((B, Fp), jnp.float32)],
        compiler_params=pltpu.CompilerParams(
            dimension_semantics=("parallel", "arbitrary")),
        cost_estimate=pl.CostEstimate(flops=flops, transcendentals=0,
                                      bytes_accessed=bytes_accessed),
    )(col, cw, cb, pool, w1_t, w2_t)

    h_i = h_out[0, :, :F]
    h_j = h_out[1, :, :F]
    z_i = z_out[0, :, :P]
    z_j = z_out[1, :, :P]
    return h_i, h_j, z_i, z_j


def ref_forward(x, conv_w, conv_b, w1, w2):
    """Pure-JAX f32 reference matching the PyTorch semantics."""
    B, C, H, W = x.shape
    F = conv_w.shape[0]
    xn = jnp.transpose(x, (0, 2, 3, 1))
    xp = jnp.pad(xn, ((0, 0), (1, 1), (1, 1), (0, 0)))
    cw = jnp.transpose(conv_w, (2, 3, 1, 0))
    acc = jnp.zeros((B, H, W, F), jnp.float32)
    for kh in range(3):
        for kw in range(3):
            acc = acc + jnp.einsum('bhwc,cf->bhwf',
                                   xp[:, kh:kh + H, kw:kw + W, :], cw[kh, kw])
    acc = jax.nn.relu(acc + conv_b)
    h = jnp.mean(acc, axis=(1, 2))
    z = jax.nn.relu(h @ w1.T) @ w2.T
    return h, z


if __name__ == "__main__":
    B, C, H, W = 2, 4, 16, 16
    n_features, projection_dim = 32, 16

    key = jax.random.PRNGKey(0)
    k_xi, k_xj, k_cw, k_cb, k_w1, k_w2 = jax.random.split(key, 6)
    x_i = jax.random.normal(k_xi, (B, C, H, W), jnp.float32)
    x_j = jax.random.normal(k_xj, (B, C, H, W), jnp.float32)
    # Deterministic synthetic parameters (PyTorch weight layouts).
    conv_w = jax.random.normal(k_cw, (n_features, C, 3, 3), jnp.float32) * 0.1
    conv_b = jax.random.normal(k_cb, (n_features,), jnp.float32) * 0.1
    w1 = jax.random.normal(k_w1, (n_features, n_features), jnp.float32) * 0.1
    w2 = jax.random.normal(k_w2, (projection_dim, n_features), jnp.float32) * 0.1

    h_i, h_j, z_i, z_j = jax.block_until_ready(
        simclr_forward(x_i, x_j, conv_w, conv_b, w1, w2, projection_dim))

    assert h_i.shape == (B, n_features) and h_j.shape == (B, n_features)
    assert z_i.shape == (B, projection_dim) and z_j.shape == (B, projection_dim)

    h_i_r, z_i_r = ref_forward(x_i, conv_w, conv_b, w1, w2)
    h_j_r, z_j_r = ref_forward(x_j, conv_w, conv_b, w1, w2)
    # bf16 MXU operands with f32 accumulation: loosened tolerance vs. the
    # f32 reference (bf16 mantissa ~3 decimal digits).
    for got, want in ((h_i, h_i_r), (h_j, h_j_r), (z_i, z_i_r), (z_j, z_j_r)):
        assert jnp.allclose(got, want, rtol=2e-2, atol=2e-2), \
            "mismatch vs reference"

    print("KERNEL_OK")
</pallas_src>

<mosaic_0001>
module attributes {stable_mosaic.version = 11 : i64} {
  func.func @_simclr_kernel(%arg0: i32, %arg1: i32, %arg2: memref<1x256x36xbf16, #tpu.memory_space<vmem>>, %arg3: memref<36x128xbf16, #tpu.memory_space<vmem>>, %arg4: memref<1x128xf32, #tpu.memory_space<vmem>>, %arg5: memref<1x256xf32, #tpu.memory_space<vmem>>, %arg6: memref<128x128xbf16, #tpu.memory_space<vmem>>, %arg7: memref<128x128xbf16, #tpu.memory_space<vmem>>, %arg8: memref<1x2x128xf32, #tpu.memory_space<vmem>>, %arg9: memref<1x2x128xf32, #tpu.memory_space<vmem>>, %arg10: memref<2x128xf32, #tpu.memory_space<vmem>>) attributes {dimension_semantics = [#tpu.dimension_semantics<parallel>, #tpu.dimension_semantics<arbitrary>], iteration_bounds = array<i64: 2, 2>, scalar_prefetch = 0 : i64, scratch_operands = 1 : i64, tpu.core_type = #tpu.core_type<tc>, window_params = [{transform_indices = @transform_0, window_bounds = array<i64: 1, 256, 36>}, {pipeline_mode = #tpu.pipeline_mode<synchronous>, transform_indices = @transform_1, window_bounds = array<i64: 36, 128>}, {pipeline_mode = #tpu.pipeline_mode<synchronous>, transform_indices = @transform_2, window_bounds = array<i64: 1, 128>}, {pipeline_mode = #tpu.pipeline_mode<synchronous>, transform_indices = @transform_3, window_bounds = array<i64: 1, 256>}, {pipeline_mode = #tpu.pipeline_mode<synchronous>, transform_indices = @transform_4, window_bounds = array<i64: 128, 128>}, {pipeline_mode = #tpu.pipeline_mode<synchronous>, transform_indices = @transform_5, window_bounds = array<i64: 128, 128>}, {transform_indices = @transform_6, window_bounds = array<i64: 1, 2, 128>}, {transform_indices = @transform_7, window_bounds = array<i64: 1, 2, 128>}]} {
    %c0 = arith.constant 0 : index
    %c0_0 = arith.constant 0 : index
    %c0_1 = arith.constant 0 : index
    %0 = vector.load %arg2[%c0, %c0_0, %c0_1] : memref<1x256x36xbf16, #tpu.memory_space<vmem>>, vector<1x256x36xbf16>
    %1 = vector.shape_cast %0 : vector<1x256x36xbf16> to vector<256x36xbf16>
    %c0_2 = arith.constant 0 : index
    %c0_3 = arith.constant 0 : index
    %2 = vector.load %arg3[%c0_2, %c0_3] : memref<36x128xbf16, #tpu.memory_space<vmem>>, vector<36x128xbf16>
    %cst = arith.constant dense<0.000000e+00> : vector<256x128xf32>
    %3 = tpu.matmul %1, %2, %cst {dimension_numbers = #tpu.dot_dimension_numbers<[1], [0], [0], [1], [0, 0, 1, 1], [], []>} : vector<256x36xbf16>, vector<36x128xbf16>, vector<256x128xf32> -> vector<256x128xf32>
    %c0_4 = arith.constant 0 : index
    %c0_5 = arith.constant 0 : index
    %4 = vector.load %arg4[%c0_4, %c0_5] : memref<1x128xf32, #tpu.memory_space<vmem>>, vector<1x128xf32>
    %5 = vector.broadcast %4 : vector<1x128xf32> to vector<256x128xf32>
    %6 = arith.addf %3, %5 : vector<256x128xf32>
    %cst_6 = arith.constant 0.000000e+00 : f32
    %7 = vector.broadcast %cst_6 : f32 to vector<256x128xf32>
    %8 = arith.maximumf %6, %7 : vector<256x128xf32>
    %c0_7 = arith.constant 0 : index
    %c0_8 = arith.constant 0 : index
    %9 = vector.load %arg5[%c0_7, %c0_8] : memref<1x256xf32, #tpu.memory_space<vmem>>, vector<1x256xf32>
    %cst_9 = arith.constant dense<0.000000e+00> : vector<1x128xf32>
    %10 = tpu.matmul %9, %8, %cst_9 {dimension_numbers = #tpu.dot_dimension_numbers<[1], [0], [0], [1], [0, 0, 1, 1], [], []>} : vector<1x256xf32>, vector<256x128xf32>, vector<1x128xf32> -> vector<1x128xf32>
    %c1_i32 = arith.constant 1 : i32
    %11 = arith.muli %arg1, %c1_i32 : i32
    %12 = arith.index_cast %11 : i32 to index
    %c0_10 = arith.constant 0 : index
    %13 = vector.load %arg10[%12, %c0_10] : memref<2x128xf32, #tpu.memory_space<vmem>>, vector<1x128xf32>
    tpu.vector_store %arg10[%12, %c0_10], %10 {strides = array<i32>} : memref<2x128xf32, #tpu.memory_space<vmem>>, vector<1x128xf32>,
    %c1_i32_11 = arith.constant 1 : i32
    %14 = arith.cmpi eq, %arg1, %c1_i32_11 : i32
    %15 = arith.extui %14 : i1 to i32
    %c0_i32 = arith.constant 0 : i32
    %16 = arith.cmpi ne, %15, %c0_i32 : i32
    scf.if %16 {
      %c0_12 = arith.constant 0 : index
      %c0_13 = arith.constant 0 : index
      %17 = vector.load %arg10[%c0_12, %c0_13] : memref<2x128xf32, #tpu.memory_space<vmem>>, vector<2x128xf32>
      %c0_14 = arith.constant 0 : index
      %c0_15 = arith.constant 0 : index
      %c0_16 = arith.constant 0 : index
      %18 = vector.load %arg8[%c0_14, %c0_15, %c0_16] : memref<1x2x128xf32, #tpu.memory_space<vmem>>, vector<1x2x128xf32>
      %19 = vector.shape_cast %18 : vector<1x2x128xf32> to vector<2x128xf32>
      %20 = vector.shape_cast %17 : vector<2x128xf32> to vector<1x2x128xf32>
      tpu.vector_store %arg8[%c0_14, %c0_15, %c0_16], %20 {strides = array<i32>} : memref<1x2x128xf32, #tpu.memory_space<vmem>>, vector<1x2x128xf32>,
      %21 = arith.truncf %17 : vector<2x128xf32> to vector<2x128xbf16>
      %c0_17 = arith.constant 0 : index
      %c0_18 = arith.constant 0 : index
      %22 = vector.load %arg6[%c0_17, %c0_18] : memref<128x128xbf16, #tpu.memory_space<vmem>>, vector<128x128xbf16>
      %cst_19 = arith.constant dense<0.000000e+00> : vector<2x128xf32>
      %23 = tpu.matmul %21, %22, %cst_19 {dimension_numbers = #tpu.dot_dimension_numbers<[1], [0], [0], [1], [0, 0, 1, 1], [], []>} : vector<2x128xbf16>, vector<128x128xbf16>, vector<2x128xf32> -> vector<2x128xf32>
      %cst_20 = arith.constant 0.000000e+00 : f32
      %24 = vector.broadcast %cst_20 : f32 to vector<2x128xf32>
      %25 = arith.maximumf %23, %24 : vector<2x128xf32>
      %26 = arith.truncf %25 : vector<2x128xf32> to vector<2x128xbf16>
      %c0_21 = arith.constant 0 : index
      %c0_22 = arith.constant 0 : index
      %27 = vector.load %arg7[%c0_21, %c0_22] : memref<128x128xbf16, #tpu.memory_space<vmem>>, vector<128x128xbf16>
      %cst_23 = arith.constant dense<0.000000e+00> : vector<2x128xf32>
      %28 = tpu.matmul %26, %27, %cst_23 {dimension_numbers = #tpu.dot_dimension_numbers<[1], [0], [0], [1], [0, 0, 1, 1], [], []>} : vector<2x128xbf16>, vector<128x128xbf16>, vector<2x128xf32> -> vector<2x128xf32>
      %c0_24 = arith.constant 0 : index
      %c0_25 = arith.constant 0 : index
      %c0_26 = arith.constant 0 : index
      %29 = vector.load %arg9[%c0_24, %c0_25, %c0_26] : memref<1x2x128xf32, #tpu.memory_space<vmem>>, vector<1x2x128xf32>
      %30 = vector.shape_cast %29 : vector<1x2x128xf32> to vector<2x128xf32>
      %31 = vector.shape_cast %28 : vector<2x128xf32> to vector<1x2x128xf32>
      tpu.vector_store %arg9[%c0_24, %c0_25, %c0_26], %31 {strides = array<i32>} : memref<1x2x128xf32, #tpu.memory_space<vmem>>, vector<1x2x128xf32>,
    } else {
    }
    return
  }
  func.func @transform_0(%arg0: i32, %arg1: i32) -> (i32, i32, i32) {
    %c0_i32 = arith.constant 0 : i32
    %c0_i32_0 = arith.constant 0 : i32
    return %arg0, %arg1, %c0_i32 : i32, i32, i32
  }
  func.func @transform_1(%arg0: i32, %arg1: i32) -> (i32, i32) {
    %c0_i32 = arith.constant 0 : i32
    %c0_i32_0 = arith.constant 0 : i32
    %c0_i32_1 = arith.constant 0 : i32
    return %c0_i32, %c0_i32_0 : i32, i32
  }
  func.func @transform_2(%arg0: i32, %arg1: i32) -> (i32, i32) {
    %c0_i32 = arith.constant 0 : i32
    %c0_i32_0 = arith.constant 0 : i32
    %c0_i32_1 = arith.constant 0 : i32
    return %c0_i32, %c0_i32_0 : i32, i32
  }
  func.func @transform_3(%arg0: i32, %arg1: i32) -> (i32, i32) {
    %c0_i32 = arith.constant 0 : i32
    %c0_i32_0 = arith.constant 0 : i32
    %c0_i32_1 = arith.constant 0 : i32
    return %c0_i32, %c0_i32_0 : i32, i32
  }
  func.func @transform_4(%arg0: i32, %arg1: i32) -> (i32, i32) {
    %c0_i32 = arith.constant 0 : i32
    %c0_i32_0 = arith.constant 0 : i32
    %c0_i32_1 = arith.constant 0 : i32
    return %c0_i32, %c0_i32_0 : i32, i32
  }
  func.func @transform_5(%arg0: i32, %arg1: i32) -> (i32, i32) {
    %c0_i32 = arith.constant 0 : i32
    %c0_i32_0 = arith.constant 0 : i32
    %c0_i32_1 = arith.constant 0 : i32
    return %c0_i32, %c0_i32_0 : i32, i32
  }
  func.func @transform_6(%arg0: i32, %arg1: i32) -> (i32, i32, i32) {
    %c0_i32 = arith.constant 0 : i32
    %c0_i32_0 = arith.constant 0 : i32
    %c0_i32_1 = arith.constant 0 : i32
    return %arg0, %c0_i32, %c0_i32_0 : i32, i32, i32
  }
  func.func @transform_7(%arg0: i32, %arg1: i32) -> (i32, i32, i32) {
    %c0_i32 = arith.constant 0 : i32
    %c0_i32_0 = arith.constant 0 : i32
    %c0_i32_1 = arith.constant 0 : i32
    return %arg0, %c0_i32, %c0_i32_0 : i32, i32, i32
  }
}

</mosaic_0001>

<bundles_post_ra>
// kernel: tpu_custom_call.1
= control target key start
LH: loop header
LB: loop body
LE: loop exit
PB: predicated region body
PF: predicated region fallthrough
CT: control target
= control target key end

     0   :  { %s1752_s0 = inlined_call_operand.vmem [shape: bf16[2,512,36], index: 0, kind: input, shape index: {}]   ;;  %s1753_s1 = inlined_call_operand.vmem [shape: bf16[36,128], index: 1, kind: input, shape index: {}]   ;;  %s1754_s2 = inlined_call_operand.vmem [shape: f32[1,128], index: 2, kind: input, shape index: {}]   ;;  %s1755_s3 = inlined_call_operand.vmem [shape: f32[1,256], index: 3, kind: input, shape index: {}]   ;;  %s1756_s4 = inlined_call_operand.vmem [shape: bf16[128,128], index: 4, kind: input, shape index: {}]   ;;  %s1757_s5 = inlined_call_operand.vmem [shape: bf16[128,128], index: 5, kind: input, shape index: {}]   ;;  %s1758_s6 = inlined_call_operand.hbm [shape: f32[2,2,128], index: 6, kind: output, shape index: {0}]   ;;  %s1759_s7 = inlined_call_operand.hbm [shape: f32[2,2,128], index: 7, kind: output, shape index: {1}]  }
   0x1   :  { %1762 = sst [smem:[#allocation12_spill]] %s1752_s0 }
   0x2   :  { %1763 = sst [smem:[#allocation13_spill]] %s1753_s1 }
   0x3   :  { %13 = vsyncpa [#allocation4], 0 }
   0x4   :  { %15 = vsyncpa [#allocation4 + $0x1], 0 }
   0x5   :  { %16 = vsyncpa [#allocation6], 0 }
   0x6   :  { %18 = vsyncpa [#allocation6 + $0x1], 0  ;;  %s1441_s24 = smov 0   ;;  %s1443_s25 = smov 0  }
   0x7   :  { %s1445_s26 = smov 0   ;;  %s1447_s27 = smov 0  }
   0x8   :  { %s1449_s28 = smov 0   ;;  %s1451_s29 = smov 0  }
   0x9   :  { %s1453_s30 = smov 0   ;;  %s1455_s8 = smov 0  }
   0xa LB: > { %1764 = sst [smem:[#allocation9_spill]] %s1395_s30  ;;  %s984_s9 = sadd.s32 4294967295, %s1399_s8   ;;  %s1399_s8 = sphi %s1455_s8, %s24_s8   ;;  %s1395_s30 = sphi %s1453_s30, %s1775_s30   ;;  %s1391_s29 = sphi %s1451_s29, %s1780_s29   ;;  %s1387_s28 = sphi %s1449_s28, %s1773_s28   ;;  %s1383_s27 = sphi %s1447_s27, %s1779_s27   ;;  %s1379_s26 = sphi %s1445_s26, %s1778_s26   ;;  %s1375_s25 = sphi %s1443_s25, %s1777_s25   ;;  %s1371_s24 = sphi %s1441_s24, %s1776_s24  }
   0xb   : > { %s985_s10 = sadd.s32 4294967294, %s1399_s8   ;;  %s33_s11 = sadd.s32 1, %s1391_s29 }
   0xc   : > { %p34_p0 = scmp.ge.s32.totalorder %s33_s11, 2  ;;  %s36_s12 = sadd.s32 1, %s1395_s30 }
   0xd   : > { %p186_p1 = scmp.ne.s32.totalorder %s1379_s26, %s1375_s25  ;;  %p187_p2 = scmp.eq.s32.totalorder %s984_s9, 3 }
   0xe   : > { %s1782_s11 = smov (%p34_p0, %s33_s11), 0  ;;  %s1784_s12 = smov (!%p34_p0, %s36_s12), %s1395_s30 }
   0xf   : > { %1765 = sst [smem:[#allocation10_spill]] %s1782_s11  ;;  %p1490_p3 = por %p187_p2, %p186_p1 }
  0x10   : > { %p192_p4 = scmp.ne.s32.totalorder %s1375_s25, %s1371_s24  ;;  %p38_p5 = scmp.ge.s32.totalorder %s1784_s12, 2 }
  0x11   : > { %p193_p6 = scmp.eq.s32.totalorder %s985_s10, 3  ;;  %p988_p7 = scmp.ge.s32.totalorder %s1399_s8, 1 }
  0x12   : > { %p265_p8 = scmp.lt.s32.totalorder %s1399_s8, 5  ;;  %s1786_s12 = smov (%p38_p5, %s1784_s12), 0 }
  0x13   : > { %1767 = sst [smem:[#allocation11_spill]] %s1786_s12  ;;  %p1500_p9 = por %p193_p6, %p192_p4 }
  0x14   : > { %p266_p10 = pnand %p988_p7, %p265_p8  ;;  %s173_s15 = ssub.s32 %s1395_s30, %s1786_s12 }
  0x15   : > { %s176_s16 = sadd.s32 1, %s1379_s26  ;;  %p174_p11 = scmp.eq.s32.totalorder %s173_s15, 0 }
  0x16   : > { %269 = sbr.rel (%p266_p10) target bundleno = 746 (0x2ea), region = 44  ;;  %s1511_s18 = sand.u32 (!%p266_p10), 1, %s1375_s25  }
  0x17   : > { %s1508_s17 = scalar_select %p174_p11, %s1379_s26, %s176_s16  }
  0x18   : > { %s1769_s1 = sld [smem:[#allocation13_spill]] (!%p266_p10)  ;;  %s991_s22 = sshll.u32 (!%p266_p10), %s1383_s27, 5 }
  0x19   : > { %p307_p12 = scmp.lt.s32.totalorder (!%p266_p10), %s1387_s28, 1  ;;  %p309_p13 = scmp.lt.s32.totalorder (!%p266_p10), %s991_s22, 63 }
  0x1a   : > { %s1770_s0 = sld [smem:[#allocation12_spill]] (!%p266_p10)  ;;  %p1082_p0 = scmp.ne.s32.totalorder (!%p266_p10), %s1383_s27, 1 }
  0x1b   : > { %vm502_vm0 = vcmask 1041408   ;;  %s308_s23 = scalar_select %p307_p12, %s1387_s28, 1  ;;  %vm453_vm1 = vcmask 293888   ;;  %v1572_v28 = vld [vmem:[%s1754_s2] ss:$0 sm:$0xff] }
  0x1c   : > { %s1788_s22 = smov (!%p309_p13, %s991_s22), 63 }
  0x1d   : > { %s992_s15 = sshll.u32 %s308_s23, 6  ;;  %s1771_s23 = sshll.u32 %s1511_s18, 1 }
  0x1e   : > { %v353_v0 = vld [vmem:[%s1769_s1 + $0x10] sm:$0x3]  ;;  %v1170_v4 = vld [vmem:[%s1769_s1 + $0x8] sm:$0xff]  ;;  %s312_s16 = sadd.s32 %s992_s15, %s1788_s22  ;;  %v1169_v5 = vld [vmem:[%s1769_s1] sm:$0xff]  ;;  %s673_s22 = scalar_lea.vmem [#allocation2], %s1383_s27 }
  0x1f   : > { %v447_v1 = vunpack.c.l.b16 %v353_v0  ;;  %s993_s19 = sshll.u32 %s312_s16, 2  ;;  %s1636_s9 = scalar_lea.vmem [#allocation3], %s1771_s23 }
  0x20   : > { %s1529_s30 = scalar_lea.vmem %s1770_s0, %s993_s19  ;;  %s1772_s10 = smov %s1771_s23 }
  0x21   : > { %v450_v2 = vpack.c.b16 %v447_v1, %v447_v1  ;;  %v1153_v6 = vld [vmem:[%s1529_s30] sm:$0xff]  ;;  %v1164_v7 = vld [vmem:[%s1529_s30 + $0x58] sm:$0xff]  ;;  %v1158_v9 = vld [vmem:[%s1529_s30 + $0x28] sm:$0xff]  ;;  %s1640_s15 = scalar_lea.vmem [#allocation5], %s1772_s10 }
  0x22   : > { %v1160_v8 = vld [vmem:[%s1529_s30 + $0x38] sm:$0xff]  ;;  %v1154_v10 = vld [vmem:[%s1529_s30 + $0x8] sm:$0xff]  ;;  %v1165_v11 = vld [vmem:[%s1529_s30 + $0x60] sm:$0xff] }
  0x23   : > { %v504_v3 = vsel %vm502_vm0, %v450_v2, 0  ;;  %v1161_v12 = vld [vmem:[%s1529_s30 + $0x40] sm:$0xff]  ;;  %v1159_v13 = vld [vmem:[%s1529_s30 + $0x30] sm:$0xff]  ;;  %v1166_v15 = vld [vmem:[%s1529_s30 + $0x68] sm:$0xff] }
  0x24   : > { %511 = vmatpush.bf16.msra.mxu0 %v504_v3  ;;  %1189 = vmatpush.bf16.msra.mxu3 %v504_v3  ;;  %v1155_v14 = vld [vmem:[%s1529_s30 + $0x10] sm:$0xff]  ;;  %v1162_v16 = vld [vmem:[%s1529_s30 + $0x48] sm:$0xff]  ;;  %v1156_v17 = vld [vmem:[%s1529_s30 + $0x18] sm:$0xff] }
  0x25   : > { %1188 = vmatpush.bf16.msra.mxu2 %v504_v3  ;;  %1187 = vmatpush.bf16.msra.mxu1 %v504_v3  ;;  %v1167_v18 = vld [vmem:[%s1529_s30 + $0x70] sm:$0xff]  ;;  %v1157_v20 = vld [vmem:[%s1529_s30 + $0x20] sm:$0xff]  ;;  %v1168_v21 = vld [vmem:[%s1529_s30 + $0x78] sm:$0xff] }
  0x26   : > { %v1163_v19 = vld [vmem:[%s1529_s30 + $0x50] sm:$0xff] }
  0x28   : > { %512 = vmatpush.bf16.msra.mxu0 %v1170_v4  ;;  %1192 = vmatpush.bf16.msra.mxu3 %v1170_v4 }
  0x29   : > { %1191 = vmatpush.bf16.msra.mxu2 %v1170_v4  ;;  %1190 = vmatpush.bf16.msra.mxu1 %v1170_v4 }
  0x2c   : > { %513 = vmatpush.bf16.msra.mxu0 %v1169_v5  ;;  %1195 = vmatpush.bf16.msra.mxu3 %v1169_v5 }
  0x2d   : > { %1194 = vmatpush.bf16.msra.mxu2 %v1169_v5  ;;  %1193 = vmatpush.bf16.msra.mxu1 %v1169_v5 }
  0x2f   : > { %1066 = vmatmul.msk.bf16.vlgmr.msra.gmra.mxu0 %vm453_vm1, %v1153_v6  ;;  %1077 = vmatmul.msk.bf16.vlgmr.msra.gmra.mxu3 %vm453_vm1, %v1164_v7 }
  0x30   : > { %1073 = vmatmul.msk.bf16.vlgmr.msra.gmra.mxu2 %vm453_vm1, %v1160_v8  ;;  %1071 = vmatmul.msk.bf16.vlgmr.msra.gmra.mxu1 %vm453_vm1, %v1158_v9 }
  0x3f   : > { %1067 = vmatmul.msk.bf16.gmra.mxu0 %vm453_vm1, %v1154_v10  ;;  %1078 = vmatmul.msk.bf16.gmra.mxu3 %vm453_vm1, %v1165_v11 }
  0x40   : > { %1074 = vmatmul.msk.bf16.gmra.mxu2 %vm453_vm1, %v1161_v12  ;;  %1072 = vmatmul.msk.bf16.gmra.mxu1 %vm453_vm1, %v1159_v13 }
  0x4f   : > { %1068 = vmatmul.msk.bf16.gmra.mxu0 %vm453_vm1, %v1155_v14  ;;  %1079 = vmatmul.msk.bf16.gmra.mxu3 %vm453_vm1, %v1166_v15 }
  0x50   : > { %1075 = vmatmul.msk.bf16.gmra.mxu2 %vm453_vm1, %v1162_v16 }
  0x5f   : > { %1069 = vmatmul.msk.bf16.gmra.mxu0 %vm453_vm1, %v1156_v17  ;;  %1080 = vmatmul.msk.bf16.gmra.mxu3 %vm453_vm1, %v1167_v18 }
  0x60   : > { %1076 = vmatmul.msk.bf16.gmra.mxu2 %vm453_vm1, %v1163_v19 }
  0x6f   : > { %1070 = vmatmul.msk.bf16.gmra.mxu0 %vm453_vm1, %v1157_v20  ;;  %1081 = vmatmul.msk.bf16.gmra.mxu3 %vm453_vm1, %v1168_v21 }
  0xac   : > { %v1563_v22 = vpop.f32.mrf.mxu0 }
  0xad   : > { %v540_v23 = vpop.f32.mrf.mxu1 }
  0xae   : > { %v541_v43 = vadd.f32 %v1572_v28, %v540_v23 }
  0xb0   : > { %v605_v49 = vmax.f32 %v541_v43, 0.0 }
  0xb2   : > { %v1565_v24 = vpop.f32.mrf.mxu3 }
  0xb3   : > { %v550_v25 = vpop.f32.mrf.mxu2 }
  0xb4   : > { %v1567_v26 = vpop.f32.mrf.mxu0  ;;  %v551_v30 = vadd.f32 %v1572_v28, %v550_v25 }
  0xb5   : > { %v542_v27 = vpop.f32.mrf.mxu1 }
  0xb6   : > { %v609_v34 = vmax.f32 %v551_v30, 0.0  ;;  %v543_v40 = vadd.f32 %v1572_v28, %v542_v27  ;;  %v518_v27 = vadd.f32 %v1572_v28, %v1567_v26 }
  0xb8   : > { %v606_v47 = vmax.f32 %v543_v40, 0.0  ;;  %v627_v40 = vld [vmem:[%s1755_s3] sm:$0x3] }
  0xba   : > { %v1574_v29 = vpop.f32.mrf.mxu3 }
  0xbb   : > { %v552_v31 = vpop.f32.mrf.mxu2 }
  0xbc   : > { %v1577_v32 = vpop.f32.mrf.mxu0  ;;  %v553_v33 = vadd.f32 %v1572_v28, %v552_v31 }
  0xbd   : > { %v545_v36 = vpop.f32.mrf.mxu1  ;;  %v521_v20 = vadd.f32 %v1572_v28, %v1577_v32 }
  0xbe   : > { %v610_v35 = vmax.f32 %v553_v33, 0.0  ;;  %v546_v41 = vadd.f32 %v1572_v28, %v545_v36 }
  0xc0   : > { %633 = vmatpush.msrb.mxu1 %v610_v35  ;;  %v607_v44 = vmax.f32 %v546_v41, 0.0  ;;  %v597_v35 = vmax.f32 %v521_v20, 0.0  ;;  %v629_v41 = vperm.slane %v627_v40, 0 }
  0xc2   : > { %v1580_v37 = vpop.f32.mrf.mxu3  ;;  %634 = vmatpush.msrb.mxu1 %v609_v34  ;;  %v516_v34 = vadd.f32 %v1572_v28, %v1563_v22  ;;  %v573_v22 = vadd.f32 %v1572_v28, %v1574_v29 }
  0xc3   : > { %v1586_v52 = vpop.f32.mrf.mxu2 }
  0xc4   : > { %v522_v38 = vpop.f32.mrf.mxu0 }
  0xc5   : > { %v547_v39 = vpop.f32.mrf.mxu1  ;;  %v523_v15 = vadd.f32 %v1572_v28, %v522_v38  ;;  %v596_v38 = vmax.f32 %v518_v27, 0.0 }
  0xc6   : > { %v548_v42 = vadd.f32 %v1572_v28, %v547_v39  ;;  %v576_v39 = vadd.f32 %v1572_v28, %v1580_v37 }
  0xc7   : > { %v598_v30 = vmax.f32 %v523_v15, 0.0 }
  0xc8   : > { %v608_v45 = vmax.f32 %v548_v42, 0.0  ;;  %v595_v42 = vmax.f32 %v516_v34, 0.0  ;;  %v619_v37 = vmax.f32 %v576_v39, 0.0 }
  0xca   : > { %v577_v46 = vpop.f32.mrf.mxu3  ;;  %635 = vmatpush.msrb.mxu1 %v608_v45  ;;  %v571_v45 = vadd.f32 %v1572_v28, %v1565_v24 }
  0xcb   : > { %v1588_v56 = vpop.f32.mrf.mxu2  ;;  %v578_v32 = vadd.f32 %v1572_v28, %v577_v46  ;;  %v618_v46 = vmax.f32 %v573_v22, 0.0 }
  0xcc   : > { %v525_v48 = vpop.f32.mrf.mxu0  ;;  %636 = vmatpush.msrb.mxu1 %v607_v44 }
  0xcd   : > { %v526_v11 = vadd.f32 %v1572_v28, %v525_v48  ;;  %v620_v43 = vmax.f32 %v578_v32, 0.0  ;;  %v617_v48 = vmax.f32 %v571_v45, 0.0 }
  0xce   : > { %637 = vmatpush.msrb.mxu1 %v606_v47 }
  0xcf   : > { %v599_v21 = vmax.f32 %v526_v11, 0.0 }
  0xd0   : > { %638 = vmatpush.msrb.mxu1 %v605_v49 }
  0xd2   : > { %v580_v50 = vpop.f32.mrf.mxu3 }
  0xd3   : > { %v1590_v60 = vpop.f32.mrf.mxu2  ;;  %v581_v31 = vadd.f32 %v1572_v28, %v580_v50 }
  0xd4   : > { %v527_v51 = vpop.f32.mrf.mxu0  ;;  %v561_v24 = vadd.f32 %v1572_v28, %v1590_v60 }
  0xd5   : > { %v528_v7 = vadd.f32 %v1572_v28, %v527_v51  ;;  %v621_v26 = vmax.f32 %v581_v31, 0.0 }
  0xd7   : > { %v600_v16 = vmax.f32 %v528_v7, 0.0 }
  0xda   : > { %v582_v53 = vpop.f32.mrf.mxu3 }
  0xdb   : > { %v1594_v1 = vpop.f32.mrf.mxu2  ;;  %v583_v23 = vadd.f32 %v1572_v28, %v582_v53  ;;  %v558_v53 = vadd.f32 %v1572_v28, %v1588_v56 }
  0xdc   : > { %v530_v54 = vpop.f32.mrf.mxu0  ;;  %v563_v29 = vadd.f32 %v1572_v28, %v1594_v1 }
  0xdd   : > { %v531_v5 = vadd.f32 %v1572_v28, %v530_v54  ;;  %v622_v36 = vmax.f32 %v583_v23, 0.0 }
  0xde   : > { %v614_v54 = vmax.f32 %v563_v29, 0.0 }
  0xdf   : > { %v601_v12 = vmax.f32 %v531_v5, 0.0 }
  0xe2   : > { %v585_v55 = vpop.f32.mrf.mxu3 }
  0xe3   : > { %v586_v17 = vadd.f32 %v1572_v28, %v585_v55  ;;  %v565_v19 = vpop.f32.mrf.mxu2  ;;  %v556_v55 = vadd.f32 %v1572_v28, %v1586_v52 }
  0xe4   : > { %v532_v57 = vpop.f32.mrf.mxu0  ;;  %v566_v49 = vadd.f32 %v1572_v28, %v565_v19 }
  0xe5   : > { %v533_v2 = vadd.f32 %v1572_v28, %v532_v57  ;;  %v623_v33 = vmax.f32 %v586_v17, 0.0  ;;  %v613_v57 = vmax.f32 %v561_v24, 0.0 }
  0xe6   : > { %v615_v51 = vmax.f32 %v566_v49, 0.0 }
  0xe7   : > { %v602_v8 = vmax.f32 %v533_v2, 0.0 }
  0xea   : > { %v587_v58 = vpop.f32.mrf.mxu3 }
  0xeb   : > { %v588_v13 = vadd.f32 %v1572_v28, %v587_v58  ;;  %v567_v44 = vpop.f32.mrf.mxu2  ;;  %v612_v58 = vmax.f32 %v558_v53, 0.0 }
  0xec   : > { %v535_v59 = vpop.f32.mrf.mxu0  ;;  %v568_v47 = vadd.f32 %v1572_v28, %v567_v44 }
  0xed   : > { %v536_v62 = vadd.f32 %v1572_v28, %v535_v59  ;;  %v624_v25 = vmax.f32 %v588_v13, 0.0  ;;  %v630_v59 = vperm.slane %v627_v40, 1 }
  0xee   : > { %v616_v50 = vmax.f32 %v568_v47, 0.0 }
  0xef   : > { %v603_v3 = vmax.f32 %v536_v62, 0.0 }
  0xf2   : > { %v590_v61 = vpop.f32.mrf.mxu3 }
  0xf3   : > { %v591_v9 = vadd.f32 %v1572_v28, %v590_v61  ;;  %v611_v61 = vmax.f32 %v556_v55, 0.0 }
  0xf4   : > { %v537_v63 = vpop.f32.mrf.mxu0 }
  0xf5   : > { %v538_v0 = vadd.f32 %v1572_v28, %v537_v63  ;;  %v625_v18 = vmax.f32 %v591_v9, 0.0 }
  0xf7   : > { %v604_v4 = vmax.f32 %v538_v0, 0.0 }
  0xf9   : > { %639 = vmatpush.msrb.mxu1 %v604_v4 }
  0xfa   : > { %v592_v6 = vpop.f32.mrf.mxu3 }
  0xfb   : > { %v593_v10 = vadd.f32 %v1572_v28, %v592_v6  ;;  %640 = vmatpush.msrb.mxu1 %v603_v3 }
  0xfd   : > { %v626_v14 = vmax.f32 %v593_v10, 0.0  ;;  %641 = vmatpush.msrb.mxu1 %v602_v8 }
  0xff   : > { %642 = vmatpush.msrb.mxu1 %v601_v12  ;;  %653 = vmatpush.msrb.mxu2 %v626_v14 }
 0x101   : > { %643 = vmatpush.msrb.mxu1 %v600_v16  ;;  %654 = vmatpush.msrb.mxu2 %v625_v18 }
 0x103   : > { %644 = vmatpush.msrb.mxu1 %v599_v21  ;;  %655 = vmatpush.msrb.mxu2 %v624_v25 }
 0x105   : > { %645 = vmatpush.msrb.mxu1 %v598_v30  ;;  %656 = vmatpush.msrb.mxu2 %v623_v33 }
 0x107   : > { %646 = vmatpush.msrb.mxu1 %v597_v35  ;;  %657 = vmatpush.msrb.mxu2 %v622_v36 }
 0x109   : > { %647 = vmatpush.msrb.mxu1 %v596_v38  ;;  %658 = vmatpush.msrb.mxu2 %v621_v26 }
 0x10b   : > { %648 = vmatpush.msrb.mxu1 %v595_v42  ;;  %659 = vmatpush.msrb.mxu2 %v620_v43 }
 0x10c   : > { %649 = vmatmul.f32.vlgmr.msrb.gmra.mxu1 %v629_v41 }
 0x10d   : > { %660 = vmatpush.msrb.mxu2 %v619_v37 }
 0x10f   : > { %661 = vmatpush.msrb.mxu2 %v618_v46 }
 0x111   : > { %662 = vmatpush.msrb.mxu2 %v617_v48 }
 0x113   : > { %663 = vmatpush.msrb.mxu2 %v616_v50 }
 0x115   : > { %664 = vmatpush.msrb.mxu2 %v615_v51 }
 0x117   : > { %665 = vmatpush.msrb.mxu2 %v614_v54 }
 0x119   : > { %666 = vmatpush.msrb.mxu2 %v613_v57 }
 0x11b   : > { %667 = vmatpush.msrb.mxu2 %v612_v58 }
 0x11d   : > { %668 = vmatpush.msrb.mxu2 %v611_v61 }
 0x11e   : > { %669 = vmatmul.f32.vlgmr.msrb.gmra.mxu2 %v630_v59 }
 0x189   : > { %v650_v60 = vpop.f32.mrf.mxu1 }
 0x1a0   : > { %678 = sbr.rel (%p1082_p0) target bundleno = 717 (0x2cd), region = 48 }
 0x1a1   : > { %v670_v62 = vpop.f32.mrf.mxu2 }
 0x1a2   : > { %v671_v56 = vadd.f32 %v670_v62, %v650_v60 }
 0x1a4   : > { %674 = vst [vmem:[%s673_s22] sm:$0x1] %v671_v56 }
 0x1a5   : > { %v1178_v28 = vld [vmem:[%s1756_s4 + $0x38] sm:$0xff]  ;;  %v1177_v52 = vld [vmem:[%s1756_s4 + $0x30] sm:$0xff]  ;;  %v1176_v2 = vld [vmem:[%s1756_s4 + $0x28] sm:$0xff] }
 0x1a6   : > { %746 = vmatpush.bf16.msra.mxu0 %v1178_v28  ;;  %v1186_v0 = vld [vmem:[%s1757_s5 + $0x38] sm:$0xff]  ;;  %v1185_v1 = vld [vmem:[%s1757_s5 + $0x30] sm:$0xff]  ;;  %v1184_v3 = vld [vmem:[%s1757_s5 + $0x28] sm:$0xff] }
 0x1a7   : > { %825 = vmatpush.bf16.msra.mxu1 %v1186_v0  ;;  %v1175_v4 = vld [vmem:[%s1756_s4 + $0x20] sm:$0xff]  ;;  %v1174_v6 = vld [vmem:[%s1756_s4 + $0x18] sm:$0xff]  ;;  %v1173_v8 = vld [vmem:[%s1756_s4 + $0x10] sm:$0xff] }
 0x1a8   : > { %v1183_v5 = vld [vmem:[%s1757_s5 + $0x20] sm:$0xff]  ;;  %v1182_v7 = vld [vmem:[%s1757_s5 + $0x18] sm:$0xff]  ;;  %v1181_v9 = vld [vmem:[%s1757_s5 + $0x10] sm:$0xff] }
 0x1a9   : > { %v1172_v10 = vld [vmem:[%s1756_s4 + $0x8] sm:$0xff]  ;;  %v1171_v12 = vld [vmem:[%s1756_s4] sm:$0xff] }
 0x1aa   : > { %747 = vmatpush.bf16.msra.mxu0 %v1177_v52  ;;  %v1180_v11 = vld [vmem:[%s1757_s5 + $0x8] sm:$0xff]  ;;  %v1179_v14 = vld [vmem:[%s1757_s5] sm:$0xff] }
 0x1ab   : > { %v679_v63 = vld [vmem:[#allocation2] sm:$0x3]  ;;  %826 = vmatpush.bf16.msra.mxu1 %v1185_v1 }
 0x1ac   : > { %680 = vst [vmem:[%s1636_s9] sm:$0x3] %v679_v63  ;;  %v681_v13 = vpack.c.bf16 %v679_v63, %v679_v63 }
 0x1ae   : > { %748 = vmatpush.bf16.msra.mxu0 %v1176_v2 }
 0x1af   : > { %827 = vmatpush.bf16.msra.mxu1 %v1184_v3 }
 0x1b2   : > { %749 = vmatpush.bf16.msra.mxu0 %v1175_v4 }
 0x1b3   : > { %828 = vmatpush.bf16.msra.mxu1 %v1183_v5 }
 0x1b6   : > { %750 = vmatpush.bf16.msra.mxu0 %v1174_v6 }
 0x1b7   : > { %829 = vmatpush.bf16.msra.mxu1 %v1182_v7 }
 0x1ba   : > { %751 = vmatpush.bf16.msra.mxu0 %v1173_v8 }
 0x1bb   : > { %830 = vmatpush.bf16.msra.mxu1 %v1181_v9 }
 0x1be   : > { %752 = vmatpush.bf16.msra.mxu0 %v1172_v10 }
 0x1bf   : > { %831 = vmatpush.bf16.msra.mxu1 %v1180_v11 }
 0x1c2   : > { %753 = vmatpush.bf16.msra.mxu0 %v1171_v12 }
 0x1c3   : > { %832 = vmatpush.bf16.msra.mxu1 %v1179_v14 }
 0x1c5   : > { %754 = vmatmul.bf16.vlgmr.msra.gmra.mxu0 %v681_v13 }
 0x242   : > { %v755_v15 = vpop.f32.mrf.mxu0 }
 0x243   : > { %v759_v16 = vmax.f32 %v755_v15, 0.0 }
 0x245   : > { %v760_v17 = vpack.c.bf16 %v759_v16, %v759_v16 }
 0x247   : > { %833 = vmatmul.bf16.vlgmr.msra.gmra.mxu1 %v760_v17 }
 0x24a   : > { %v757_v18 = vpop.f32.mrf.mxu0 }
 0x2c4   : > { %v834_v19 = vpop.f32.mrf.mxu1 }
 0x2c5   : > { %838 = vst [vmem:[%s1640_s15] sm:$0x3] %v834_v19 }
 0x2cc   : > { %v836_v20 = vpop.f32.mrf.mxu1 }
 0x2cd PF: > { %s1149_s10 = sshll.u32 %s1387_s28, 1  ;;  %s857_s11 = sshll.u32 %s1636_s9, 4  ;;  %s858_s11 = int_to_ptr.vmem [resolvable:$true] %s857_s11 }
 0x2ce   : > { %s855_s20 = scalar_lea.hbm %s1758_s6, %s1149_s10  ;;  %s840_s30 = scalar_lea.sflag [#allocation4], %s1511_s18 }
 0x2cf   : > { %s859_s12 = sshll.u32 %s855_s20, 4  ;;  %s1293_s28 = scalar_lea.hbm %s1758_s6, 4  ;;  %s860_s12 = int_to_ptr.hbm [resolvable:$true] %s859_s12 }
 0x2d0   : > { %s1287_s21 = sshra.s32 %s860_s12, 4  ;;  %s1288_s21 = int_to_ptr.hbm [resolvable:$true] %s1287_s21 }
 0x2d1   : > { %s1289_s27 = scalar_lea.hbm %s1288_s21, 2  ;;  %p1294_p5 = scmp.lt.s32.totalorder %s1288_s21, %s1758_s6 }
 0x2d2   : > { %p1290_p1 = scmp.ne.s32.totalorder %s1288_s21, %s1289_s27  ;;  %p1295_p6 = scmp.lt.s32.totalorder %s1293_s28, %s1289_s27 }
 0x2d4   : > { %p1291_p2 = pnand %p1290_p1, %p1490_p3  ;;  %p1296_p7 = por %p1295_p6, %p1294_p5 }
 0x2d6   : > { %p1292_p4 = pneg %p1291_p2 }
 0x2d8   : > { %p1297_p8 = pnand %p1296_p7, %p1292_p4 }
 0x2da   : > { %1300 = shalt.err (!%p1297_p8)
}
 0x2db   : > { %1196 = dma.vmem_to_hbm [thread:$0]  (%p1490_p3), %s858_s11, 32, %s860_s12, %s840_s30  }
 0x2dc   : > { %s869_s19 = scalar_lea.hbm %s1759_s7, %s1149_s10  ;;  %s871_s20 = sshll.u32 %s1640_s15, 4  ;;  %s872_s20 = int_to_ptr.vmem [resolvable:$true] %s871_s20 }
 0x2dd   : > { %s873_s22 = sshll.u32 %s869_s19, 4  ;;  %s845_s0 = scalar_lea.sflag [#allocation6], %s1511_s18  ;;  %s874_s22 = int_to_ptr.hbm [resolvable:$true] %s873_s22 }
 0x2de   : > { %s1315_s1 = sshra.s32 %s874_s22, 4  ;;  %s1321_s11 = scalar_lea.hbm %s1759_s7, 4  ;;  %s1316_s1 = int_to_ptr.hbm [resolvable:$true] %s1315_s1 }
 0x2df   : > { %s1317_s21 = scalar_lea.hbm %s1316_s1, 2  ;;  %p1322_p13 = scmp.lt.s32.totalorder %s1316_s1, %s1759_s7 }
 0x2e0   : > { %p1318_p10 = scmp.ne.s32.totalorder %s1316_s1, %s1317_s21  ;;  %p1323_p0 = scmp.lt.s32.totalorder %s1321_s11, %s1317_s21 }
 0x2e2   : > { %p1319_p11 = pnand %p1318_p10, %p1490_p3  ;;  %p1324_p1 = por %p1323_p0, %p1322_p13 }
 0x2e4   : > { %p1320_p12 = pneg %p1319_p11 }
 0x2e6   : > { %p1325_p2 = pnand %p1324_p1, %p1320_p12 }
 0x2e8   : > { %1328 = shalt.err (!%p1325_p2)
}
 0x2e9   : > { %1197 = dma.vmem_to_hbm [thread:$0]  (%p1490_p3), %s872_s20, 32, %s874_s22, %s845_s0  }
 0x2ea PF: > { %p1207_p4 = scmp.ge.s32.totalorder %s1399_s8, 2  ;;  %s885_s18 = sand.u32 1, %s1371_s24  }
 0x2eb   : > { %s886_s15 = scalar_lea.sflag [#allocation4], %s885_s18 }
 0x2ec   : > { %p1201_p5 = pnand %p1207_p4, %p1500_p9 }
 0x2ee   : > { %p1202_p6 = pneg %p1201_p5 }
 0x2f0   : > { %1362 = dma.done.wait (%p1202_p6), %s886_s15, 32  }
 0x2f1   : > { %1364 = vsyncadd (%p1202_p6), %s886_s15, 4294967264  ;;  %s896_s10 = scalar_lea.sflag [#allocation6], %s885_s18 }
 0x2f2   : > { %1366 = dma.done.wait (%p1202_p6), %s896_s10, 32  }
 0x2f3   : > { %1368 = vsyncadd (%p1202_p6), %s896_s10, 4294967264  ;;  %s24_s8 = sadd.s32 1, %s1399_s8   ;;  %s1773_s28 = sld [smem:[#allocation9_spill]] }
 0x2f4   : > { %p21_p7 = scmp.ge.s32.totalorder %s24_s8, 6   ;;  %s1774_s13 = sld [smem:[#allocation10_spill]] }
 0x2f5   : > { %s1775_s30 = sld [smem:[#allocation11_spill]]  ;;  %s1776_s24 = smov %s1375_s25 }
 0x2f6   : > { %s1777_s25 = smov %s1379_s26  ;;  %s1778_s26 = smov %s1508_s17 }
 0x2f7   : > { %s1779_s27 = smov %s1391_s29  ;;  %23 = sbr.rel (!%p21_p7) target bundleno = 10 (0xa), region = 101 }
 0x2fa   : > { %s1780_s29 = smov %s1774_s13 }
 0x2fc   :  { %902 = vsyncpa [#allocation4], 1 }
 0x2fd   :  { %904 = vsyncpa [#allocation4 + $0x1], 1 }
 0x2fe   :  { %905 = vsyncpa [#allocation6], 1 }
 0x2ff   :  { %907 = vsyncpa [#allocation6 + $0x1], 1 }

</bundles_post_ra>
